<compile_context>
chip_gen: v7x
topology: tpu7x:2x2x1
jax: 0.10.0
libtpu: 0.0.40
codegen_flags: <defaults>
</compile_context>

<pallas_src>
import functools

import jax
import jax.numpy as jnp
from jax.experimental import pallas as pl
from jax.experimental.pallas import tpu as pltpu

OUT_FEATURES = 4
SMOOTH_EPS = 0.001
SMOOTH_SCALE = 1.0 / (1.0 + SMOOTH_EPS * OUT_FEATURES)  # fold the divide into a constant mul


def feature_policy_kernel(xT_ref, w_ref, b_ref, oT_ref):
    # xT_ref: (1, TB)   batch on the lane axis
    # w_ref : (4, 1)    PyTorch Linear weight layout (out_features, in_features=1)
    # b_ref : (4, 1)
    # oT_ref: (4, TB)   lane-dense output tile
    xT = xT_ref[...]
    w = w_ref[...]
    b = b_ref[...]

    # Linear(1, 4): pure VPU broadcast multiply-add, (4,1)*(1,TB)+(4,1) -> (4,TB).
    logits = w * xT + b

    # Numerically stable softmax over the feature axis (sublane axis, size 4).
    m = jnp.max(logits, axis=0, keepdims=True)   # (1, TB)
    e = jnp.exp(logits - m)                      # (4, TB)  (EUP)
    s = jnp.sum(e, axis=0, keepdims=True)        # (1, TB)
    p = e / s                                    # exact divide: free at this roofline

    # (p + eps) / (1 + eps*4)  ==  (p + eps) * SMOOTH_SCALE
    oT_ref[...] = ((p + SMOOTH_EPS) * SMOOTH_SCALE).astype(oT_ref.dtype)


def _round_up(a, m):
    return ((a + m - 1) // m) * m


def feature_policy(
    x,
    weight,
    bias,
    *,
    max_tile=256 * 1024,      # elements per batch tile; ~10 MiB dbl-buffered VMEM (safe on v5e)
    min_kernel_batch=32768,   # below this, plain fused XLA beats the pallas_call launch floor
    out_dtype=jnp.float32,    # set jnp.bfloat16 to halve store traffic if consumer tolerates it
    return_lane_dense=False,  # True -> return (4, B) and skip the expensive output transpose
    force_kernel=False,
):
    """FeaturePolicy forward.

    x:      (B, 1)  float   -- same layout as the PyTorch nn.Linear input.
    weight: (4, 1)  float   -- PyTorch nn.Linear weight (out_features, in_features).
    bias:   (4,)    float   -- PyTorch nn.Linear bias.
    returns (B, 4) (or (4, B) if return_lane_dense=True).
    """
    B = x.shape[0]
    nf = weight.shape[0]

    w = weight.astype(jnp.float32).reshape(nf, 1)
    b = bias.astype(jnp.float32).reshape(nf, 1)

    if (B < min_kernel_batch) and not force_kernel:
        # Small-B fallback: the whole op is below the pallas_call launch floor.
        logits = x.astype(jnp.float32) * w.T + b.T          # (B,1)*(1,4)+(1,4) -> (B,4)
        p = jax.nn.softmax(logits, axis=1)
        out = ((p + SMOOTH_EPS) * SMOOTH_SCALE).astype(out_dtype)
        return out.T if return_lane_dense else out

    # Batch tile: >=2 tiles when possible (v7x has 2 TCs), lane-aligned, capped so the
    # double-buffered footprint stays under every generation's scoped VMEM default.
    TB = max(128, min(max_tile, _round_up(pl.cdiv(B, 2), 128)))
    grid = (pl.cdiv(B, TB),)

    # Batch on the lane axis; no explicit pad -- Pallas masks the partial last block.
    xT = x.astype(jnp.float32).reshape(1, B)

    oT = pl.pallas_call(
        feature_policy_kernel,
        out_shape=jax.ShapeDtypeStruct((nf, B), out_dtype),
        grid=grid,
        in_specs=[
            pl.BlockSpec((1, TB), lambda i: (0, i)),
            pl.BlockSpec((nf, 1), lambda i: (0, 0)),
            pl.BlockSpec((nf, 1), lambda i: (0, 0)),
        ],
        out_specs=pl.BlockSpec((nf, TB), lambda i: (0, i)),
        compiler_params=pltpu.CompilerParams(
            dimension_semantics=("parallel",),  # shard batch tiles across v7x's 2 TCs
        ),
    )(xT, w, b)

    if return_lane_dense:
        return oT
    # NOTE: this transpose to the PyTorch (B, 4) layout is an extra XLA pass that costs
    # more HBM traffic than the kernel; prefer return_lane_dense=True and fuse it into
    # the consumer when the downstream layout allows it.
    return oT.T


def feature_policy_ref(x, weight, bias):
    logits = x.astype(jnp.float32) @ weight.T.astype(jnp.float32) + bias[None, :].astype(jnp.float32)
    p = jax.nn.softmax(logits, axis=1)
    return (p + SMOOTH_EPS) / (1.0 + SMOOTH_EPS * OUT_FEATURES)


if __name__ == "__main__":
    key = jax.random.PRNGKey(0)
    k_x, k_w, k_b, k_x2 = jax.random.split(key, 4)

    in_features, out_features = 1, OUT_FEATURES

    # nn.Linear default init: U(-1/sqrt(fan_in), 1/sqrt(fan_in)), fan_in = 1.
    bound = 1.0 / jnp.sqrt(jnp.float32(in_features))
    weight = jax.random.uniform(k_w, (out_features, in_features), jnp.float32, -bound, bound)
    bias = jax.random.uniform(k_b, (out_features,), jnp.float32, -bound, bound)

    # 1) Tiny batch through the default path (small-B XLA fallback).
    B_small = 8
    x_small = jax.random.normal(k_x, (B_small, in_features), jnp.float32)
    out_small = jax.block_until_ready(feature_policy(x_small, weight, bias))
    ref_small = feature_policy_ref(x_small, weight, bias)
    assert out_small.shape == (B_small, out_features)
    assert jnp.allclose(out_small, ref_small, atol=1e-5, rtol=1e-5), "fallback mismatch"

    # 2) Same tiny batch, forcing the Pallas kernel (single partial 128-lane block).
    out_k = jax.block_until_ready(feature_policy(x_small, weight, bias, force_kernel=True))
    assert out_k.shape == (B_small, out_features)
    assert jnp.allclose(out_k, ref_small, atol=1e-5, rtol=1e-5), "kernel mismatch (B=8)"

    # 3) Non-multiple-of-128 batch, forcing the kernel: 2 tiles, masked partial last block.
    B_med = 300
    x_med = jax.random.normal(k_x2, (B_med, in_features), jnp.float32)
    out_m = jax.block_until_ready(feature_policy(x_med, weight, bias, force_kernel=True))
    ref_m = feature_policy_ref(x_med, weight, bias)
    assert out_m.shape == (B_med, out_features)
    assert jnp.allclose(out_m, ref_m, atol=1e-5, rtol=1e-5), "kernel mismatch (B=300)"

    # 4) Lane-dense output path (consumer-fused transpose) also matches.
    out_ld = jax.block_until_ready(
        feature_policy(x_med, weight, bias, force_kernel=True, return_lane_dense=True)
    )
    assert out_ld.shape == (out_features, B_med)
    assert jnp.allclose(out_ld.T, ref_m, atol=1e-5, rtol=1e-5), "lane-dense mismatch"

    print("KERNEL_OK")
</pallas_src>

<mosaic_0001>
module attributes {stable_mosaic.version = 11 : i64} {
  func.func @feature_policy_kernel(%arg0: i32, %arg1: memref<1x128xf32, #tpu.memory_space<vmem>>, %arg2: memref<4x1xf32, #tpu.memory_space<vmem>>, %arg3: memref<4x1xf32, #tpu.memory_space<vmem>>, %arg4: memref<4x128xf32, #tpu.memory_space<vmem>>) attributes {dimension_semantics = [#tpu.dimension_semantics<parallel>], iteration_bounds = array<i64: 1>, scalar_prefetch = 0 : i64, scratch_operands = 0 : i64, tpu.core_type = #tpu.core_type<tc>, window_params = [{transform_indices = @transform_0, window_bounds = array<i64: 1, 128>}, {pipeline_mode = #tpu.pipeline_mode<synchronous>, transform_indices = @transform_1, window_bounds = array<i64: 4, 1>}, {pipeline_mode = #tpu.pipeline_mode<synchronous>, transform_indices = @transform_2, window_bounds = array<i64: 4, 1>}, {transform_indices = @transform_3, window_bounds = array<i64: 4, 128>}]} {
    %c0 = arith.constant 0 : index
    %c0_0 = arith.constant 0 : index
    %0 = vector.load %arg1[%c0, %c0_0] : memref<1x128xf32, #tpu.memory_space<vmem>>, vector<1x128xf32>
    %c0_1 = arith.constant 0 : index
    %c0_2 = arith.constant 0 : index
    %1 = vector.load %arg2[%c0_1, %c0_2] : memref<4x1xf32, #tpu.memory_space<vmem>>, vector<4x1xf32>
    %c0_3 = arith.constant 0 : index
    %c0_4 = arith.constant 0 : index
    %2 = vector.load %arg3[%c0_3, %c0_4] : memref<4x1xf32, #tpu.memory_space<vmem>>, vector<4x1xf32>
    %3 = vector.broadcast %1 : vector<4x1xf32> to vector<4x128xf32>
    %4 = vector.broadcast %0 : vector<1x128xf32> to vector<4x128xf32>
    %5 = arith.mulf %3, %4 : vector<4x128xf32>
    %6 = vector.broadcast %2 : vector<4x1xf32> to vector<4x128xf32>
    %7 = arith.addf %5, %6 : vector<4x128xf32>
    %cst = arith.constant dense<0xFF800000> : vector<128xf32>
    %8 = vector.multi_reduction <maximumf>, %7, %cst [0] : vector<4x128xf32> to vector<128xf32>
    %9 = vector.shape_cast %8 : vector<128xf32> to vector<1x128xf32>
    %10 = vector.broadcast %9 : vector<1x128xf32> to vector<4x128xf32>
    %11 = arith.subf %7, %10 : vector<4x128xf32>
    %12 = math.exp %11 : vector<4x128xf32>
    %cst_5 = arith.constant dense<0.000000e+00> : vector<128xf32>
    %13 = vector.multi_reduction <add>, %12, %cst_5 [0] : vector<4x128xf32> to vector<128xf32>
    %14 = vector.shape_cast %13 : vector<128xf32> to vector<1x128xf32>
    %15 = vector.broadcast %14 : vector<1x128xf32> to vector<4x128xf32>
    %16 = arith.divf %12, %15 : vector<4x128xf32>
    %cst_6 = arith.constant 1.000000e-03 : f32
    %17 = vector.broadcast %cst_6 : f32 to vector<4x128xf32>
    %18 = arith.addf %16, %17 : vector<4x128xf32>
    %cst_7 = arith.constant 0.996015965 : f32
    %19 = vector.broadcast %cst_7 : f32 to vector<4x128xf32>
    %20 = arith.mulf %18, %19 : vector<4x128xf32>
    %c0_8 = arith.constant 0 : index
    %c0_9 = arith.constant 0 : index
    %21 = vector.load %arg4[%c0_8, %c0_9] : memref<4x128xf32, #tpu.memory_space<vmem>>, vector<4x128xf32>
    tpu.vector_store %arg4[%c0_8, %c0_9], %20 {strides = array<i32>} : memref<4x128xf32, #tpu.memory_space<vmem>>, vector<4x128xf32>,
    return
  }
  func.func @transform_0(%arg0: i32) -> (i32, i32) {
    %c0_i32 = arith.constant 0 : i32
    %c0_i32_0 = arith.constant 0 : i32
    return %c0_i32, %arg0 : i32, i32
  }
  func.func @transform_1(%arg0: i32) -> (i32, i32) {
    %c0_i32 = arith.constant 0 : i32
    %c0_i32_0 = arith.constant 0 : i32
    %c0_i32_1 = arith.constant 0 : i32
    return %c0_i32, %c0_i32_0 : i32, i32
  }
  func.func @transform_2(%arg0: i32) -> (i32, i32) {
    %c0_i32 = arith.constant 0 : i32
    %c0_i32_0 = arith.constant 0 : i32
    %c0_i32_1 = arith.constant 0 : i32
    return %c0_i32, %c0_i32_0 : i32, i32
  }
  func.func @transform_3(%arg0: i32) -> (i32, i32) {
    %c0_i32 = arith.constant 0 : i32
    %c0_i32_0 = arith.constant 0 : i32
    return %c0_i32, %arg0 : i32, i32
  }
}

</mosaic_0001>

<bundles_post_ra>
// kernel: tpu_custom_call.1
= control target key start
LH: loop header
LB: loop body
LE: loop exit
PB: predicated region body
PF: predicated region fallthrough
CT: control target
= control target key end

     0   :  { %v105_v1 = vmov 0   ;;  %s148_s0 = inlined_call_operand.vmem [shape: f32[1,8], index: 0, kind: input, shape index: {}]   ;;  %s149_s1 = inlined_call_operand.vmem [shape: f32[4,1], index: 1, kind: input, shape index: {}]   ;;  %s150_s2 = inlined_call_operand.vmem [shape: f32[4,1], index: 2, kind: input, shape index: {}]   ;;  %s151_s3 = inlined_call_operand.hbm [shape: f32[4,8], index: 3, kind: output, shape index: {}]  }
   0x1   :  { %v16_v0 = vld [vmem:[%s149_s1] sm:$0xf]  ;;  %76 = vset.pattern.permute.xlu0 %v105_v1 }
   0x2   :  { %8 = vsyncpa [#allocation3], 0  ;;  %20 = vperm.xlu0 %76, %v16_v0   ;;  %v17_v2 = vld [vmem:[%s150_s2] sm:$0xf]  ;;  %vm36_vm0 = vcmask 1043456  }
   0x3   :  { %v73_v4 = vld [vmem:[%s148_s0] ss:$0 sm:$0xff]  ;;  %s106_s0 = smov [#allocation2]  }
   0x4   :  { %s65_s1 = sshll.u32 %s106_s0, 4  ;;  %s66_s1 = int_to_ptr.vmem [resolvable:$true] %s65_s1 }
   0x5   :  { %s81_s2 = scalar_lea.vmem %s66_s1, 64  ;;  %p86_p1 = scmp.lt.s32.totalorder %s66_s1, %s66_s1 }
   0x6   :  { %32 = vperm.xlu0 %76, %v17_v2   ;;  %p82_p0 = scmp.ne.s32.totalorder %s66_s1, %s81_s2  ;;  %p87_p2 = scmp.lt.s32.totalorder %s81_s2, %s81_s2 }
   0x8   :  { %p88_p3 = por %p87_p2, %p86_p1 }
   0xa   :  { %p89_p4 = pnand %p88_p3, %p82_p0 }
  0x81   :  { %v21_v3 = vpop.permute.xlu0 %20 }
  0x82   :  { %v29_v5 = vmul.f32 %v73_v4, %v21_v3 }
  0x85   :  { %v33_v6 = vpop.permute.xlu0 %32 }
  0x86   :  { %v35_v7 = vadd.f32 %v33_v6, %v29_v5 }
  0x88   :  { %v37_v8 = vsel %vm36_vm0, %v35_v7, -inf }
  0x89   :  { %v38_v9 = vrot.slane %v37_v8, 4 }
  0x8b   :  { %v39_v10 = vmax.f32 %v37_v8, %v38_v9 }
  0x8d   :  { %v40_v11 = vrot.slane %v39_v10, 2 }
  0x8f   :  { %v41_v12 = vmax.f32 %v39_v10, %v40_v11 }
  0x91   :  { %v42_v13 = vrot.slane %v41_v12, 1 }
  0x93   :  { %v43_v14 = vmax.f32 %v41_v12, %v42_v13 }
  0x95   :  { %v44_v15 = vsub.f32 %v35_v7, %v43_v14 }
  0x97   :  { %v45_v16 = vmul.f32 1.442695, %v44_v15 }
  0x99   :  { %77 = vpow2.f32 %v45_v16 }
  0xa3   :  { %v78_v17 = vpop.eup %77 }
  0xa4   :  { %v47_v18 = vsel %vm36_vm0, %v78_v17, 0.0 }
  0xa5   :  { %v48_v19 = vrot.slane %v47_v18, 4 }
  0xa7   :  { %v49_v20 = vadd.f32 %v48_v19, %v47_v18 }
  0xa9   :  { %v50_v21 = vrot.slane %v49_v20, 2 }
  0xab   :  { %v51_v22 = vadd.f32 %v50_v21, %v49_v20 }
  0xad   :  { %v52_v23 = vrot.slane %v51_v22, 1 }
  0xaf   :  { %v53_v24 = vadd.f32 %v52_v23, %v51_v22 }
  0xb1   :  { %79 = vrcp.f32 %v53_v24 }
  0xbb   :  { %v80_v25 = vpop.eup %79 }
  0xbc   :  { %v55_v26 = vmul.f32 %v80_v25, %v78_v17 }
  0xbe   :  { %v56_v27 = vadd.f32 0.001, %v55_v26 }
  0xc0   :  { %v57_v28 = vmul.f32 0.99601597, %v56_v27 }
  0xc2   :  { %58 = vst [vmem:[#allocation2] sm:$0xf] %v57_v28 }
  0xc3   :  { %92 = shalt.err (!%p89_p4)
}
  0xc4   :  { %s93_s20 = scalar_lea.hbm %s151_s3, 64 }
  0xc5   :  { %p94_p5 = scmp.ne.s32.totalorder %s151_s3, %s93_s20  ;;  %p97_p6 = scmp.lt.u32.totalorder %s93_s20, %s151_s3 }
  0xc7   :  { %p99_p7 = pnand %p97_p6, %p94_p5 }
  0xc9   :  { %102 = shalt.err (!%p99_p7)
}
  0xca   :  { %68 = dma.vmem_to_hbm [thread:$0]  %s66_s1, 64, %s151_s3, [#allocation3]  }
  0xcb   :  { %103 = dma.done.wait [#allocation3], 64  }
  0xcc   :  { %104 = vsyncadd [#allocation3], 4294967232 }
  0xcd   :  { %72 = vsyncpa [#allocation3], 1 }

</bundles_post_ra>
